<compile_context>
chip_gen: v5e
topology: v5e:2x2
jax: 0.10.0
libtpu: 0.0.40
codegen_flags: <defaults>
</compile_context>

<pallas_src>
import jax
import jax.numpy as jnp
from jax.experimental import pallas as pl
from jax.experimental.pallas import tpu as pltpu  # noqa: F401  (TPU backend)

# ---- problem sizes (small, consistent with the module) ----------------------
X_DIM = 2          # x_dim
Y_DIM = 1          # y_dim
R_DIM = 32         # r_dim  (x_transf_dim = r_dim since x_transf_dim=-1)
B = 2              # batch_size
N_CNTXT = 16       # number of context points
N_TRGT = 16        # number of target points

# packed-weight slot indices -------------------------------------------------
(I_WXE2, I_WXY1, I_WXY2, I_WENCRES,
 I_WD1, I_WD2, I_WD3, I_WD4, I_WD5) = range(9)
(J_BXE1, J_BXE2, J_BYR, J_BXY1, J_BXY2, J_BENCRES,
 J_BD1, J_BD2, J_BD3, J_BD4, J_BD5) = range(11)


# ---- small in-kernel helpers -------------------------------------------------
def _relu(x):
    return jnp.maximum(x, 0.0)


def _softplus(x):
    # numerically stable softplus, lowers cleanly in Mosaic
    return jnp.maximum(x, 0.0) + jnp.log1p(jnp.exp(-jnp.abs(x)))


# ---- fused kernel: x-encode, xy-encode, mean-pool, decode, transform ---------
def make_npf_kernel(n_batch, n_cntxt, n_trgt, x_dim, y_dim, r_dim):
    def kernel(xc_ref, yc_ref, xt_ref, wsm_ref, wst_ref, bst_ref, out_ref):
        wsm = wsm_ref[...]            # (x_dim + y_dim, r_dim) : wxe1 rows, wyr row
        bia = bst_ref[...]            # (11, r_dim)
        xc = xc_ref[...]              # (n_batch*n_cntxt, x_dim)
        yc = yc_ref[...]              # (n_batch*n_cntxt, y_dim)
        xt = xt_ref[...]              # (n_batch*n_trgt, x_dim)
        mc = n_batch * n_cntxt

        def lin(x, wi, bj):
            return (jnp.dot(x, wst_ref[wi], preferred_element_type=jnp.float32)
                    + bia[bj:bj + 1, :])

        # --- x_encoder (shared weights) on contexts + targets in one pass.
        # K = x_dim (<= 2) input projection stays on the VPU: broadcast MAs,
        # no MXU round trip for a (M,2)x(2,r) matmul.
        x_all = jnp.concatenate([xc, xt], axis=0)       # (mc + mt, x_dim)
        h = bia[J_BXE1:J_BXE1 + 1, :]
        for d in range(x_dim):
            h = h + x_all[:, d:d + 1] * wsm[d:d + 1, :]
        x_tr = lin(_relu(h), I_WXE2, J_BXE2)            # (mc + mt, r_dim)
        x_tr_c = x_tr[:mc]
        x_tr_t = x_tr[mc:]

        # --- XY encoder, sum-merge (Y resize on VPU, K = y_dim)
        y_res = bia[J_BYR:J_BYR + 1, :]
        for d in range(y_dim):
            y_res = y_res + yc[:, d:d + 1] * wsm[x_dim + d:x_dim + d + 1, :]
        h = _relu(x_tr_c + y_res)
        h = _relu(lin(h, I_WXY1, J_BXY1))
        h = _relu(lin(h, I_WXY2, J_BXY2))

        # --- encode_globally (mean pool per batch) + decoder R-resize.
        # Linearity twice over: mean(.) and the two back-to-back Linears
        # (wxy3 then wres) commute, so both were fused at pack time into
        # W_encres / b_encres.  One tall (mc, r) x (r, r) MXU matmul here,
        # per-batch means on sublane-aligned 16-row slices afterwards.
        rw = jnp.dot(h, wst_ref[I_WENCRES], preferred_element_type=jnp.float32)
        h_parts = []
        for i in range(n_batch):
            r_res_i = (jnp.mean(rw[i * n_cntxt:(i + 1) * n_cntxt],
                                axis=0, keepdims=True)
                       + bia[J_BENCRES:J_BENCRES + 1, :])   # (1, r_dim)
            # trgt_dependent_representation: broadcast R to that batch's targets
            h_parts.append(_relu(x_tr_t[i * n_trgt:(i + 1) * n_trgt] + r_res_i))
        h = jnp.concatenate(h_parts, axis=0)            # (n_batch*n_trgt, r_dim)

        # --- decoder sub-MLP: 4 hidden layers, last layer zero-padded to r_dim
        h = _relu(lin(h, I_WD1, J_BD1))
        h = _relu(lin(h, I_WD2, J_BD2))
        h = _relu(lin(h, I_WD3, J_BD3))
        h = _relu(lin(h, I_WD4, J_BD4))
        suff = lin(h, I_WD5, J_BD5)                     # (n_batch*n_trgt, r_dim)

        # p_y_loc_transformer = identity on lanes [0, y_dim);
        # p_y_scale_transformer = 0.01 + 0.99*softplus on the rest.
        # One lane-dense store; wrapper slices loc/scale (lanes >= 2*y_dim are
        # padding and discarded).
        lane = jax.lax.broadcasted_iota(jnp.int32, suff.shape, 1)
        out_ref[...] = jnp.where(lane < y_dim, suff,
                                 0.01 + 0.99 * _softplus(suff))

    return kernel


# ---- parameter init (deterministic, in-script) -------------------------------
def init_params(key):
    shapes = {
        "wxe1": (X_DIM, R_DIM), "wxe2": (R_DIM, R_DIM),
        "wyr": (Y_DIM, R_DIM),
        "wxy1": (R_DIM, R_DIM), "wxy2": (R_DIM, R_DIM), "wxy3": (R_DIM, R_DIM),
        "wres": (R_DIM, R_DIM),
        "wd1": (R_DIM, R_DIM), "wd2": (R_DIM, R_DIM), "wd3": (R_DIM, R_DIM),
        "wd4": (R_DIM, R_DIM), "wd5": (R_DIM, 2 * Y_DIM),
    }
    params = {}
    keys = jax.random.split(key, len(shapes))
    for k, (name, shp) in zip(keys, sorted(shapes.items())):
        fan_in, fan_out = shp
        std = (2.0 / (fan_in + fan_out)) ** 0.5
        params[name] = (jax.random.normal(k, shp, jnp.float32) * std)
        params["b" + name[1:]] = jnp.zeros((1, fan_out), jnp.float32)
    return params


def pack_params(p):
    """Pack 28 weight/bias tensors into 3 kernel operands.

    The XY-encoder output Linear (wxy3, bxy3) and the decoder R-resize Linear
    (wres, bres) are algebraically fused here: since mean-pool is linear,
        mean(h @ wxy3 + bxy3) @ wres + bres
      = mean(h @ (wxy3 @ wres)) + (bxy3 @ wres + bres)
    which removes one MXU matmul from the kernel.
    """
    w_small = jnp.concatenate([p["wxe1"], p["wyr"]], axis=0)    # (x+y, r)
    w_encres = p["wxy3"] @ p["wres"]                            # (r, r)
    b_encres = p["bxy3"] @ p["wres"] + p["bres"]                # (1, r)
    wd5_pad = jnp.zeros((R_DIM, R_DIM), jnp.float32).at[:, :2 * Y_DIM].set(p["wd5"])
    bd5_pad = jnp.zeros((R_DIM,), jnp.float32).at[:2 * Y_DIM].set(p["bd5"][0])
    w_stack = jnp.stack([p["wxe2"], p["wxy1"], p["wxy2"], w_encres,
                         p["wd1"], p["wd2"], p["wd3"], p["wd4"], wd5_pad], axis=0)
    b_stack = jnp.stack([p["bxe1"][0], p["bxe2"][0], p["byr"][0],
                         p["bxy1"][0], p["bxy2"][0], b_encres[0],
                         p["bd1"][0], p["bd2"][0], p["bd3"][0], p["bd4"][0],
                         bd5_pad], axis=0)
    return w_small, w_stack, b_stack


# ---- forward wrapper ----------------------------------------------------------
@jax.jit
def neural_process_forward(X_cntxt, Y_cntxt, X_trgt, w_small, w_stack, b_stack):
    Bsz, Nc, x_dim = X_cntxt.shape
    Nt = X_trgt.shape[1]
    y_dim = Y_cntxt.shape[-1]
    r_dim = w_stack.shape[-1]

    # flatten batch*points into rows (metadata-only reshape)
    xc = X_cntxt.reshape(Bsz * Nc, x_dim)
    yc = Y_cntxt.reshape(Bsz * Nc, y_dim)
    xt = X_trgt.reshape(Bsz * Nt, x_dim)

    # advisory cost estimate for the tiny fused custom call
    rows = Bsz * (Nc + Nt) + 2 * Bsz * Nc + Bsz * Nc + 5 * Bsz * Nt
    ce = pl.CostEstimate(
        flops=2 * rows * r_dim * r_dim,
        transcendentals=2 * Bsz * Nt * r_dim,
        bytes_accessed=4 * (xc.size + yc.size + xt.size + w_small.size
                            + w_stack.size + b_stack.size + Bsz * Nt * r_dim),
    )

    kernel = make_npf_kernel(Bsz, Nc, Nt, x_dim, y_dim, r_dim)
    out = pl.pallas_call(
        kernel,
        out_shape=jax.ShapeDtypeStruct((Bsz * Nt, r_dim), jnp.float32),
        cost_estimate=ce,
    )(xc, yc, xt, w_small, w_stack, b_stack)

    out = out.reshape(Bsz, Nt, r_dim)
    loc = out[..., :y_dim]                  # p_y_loc_transformer = identity
    scale = out[..., y_dim:2 * y_dim]       # already 0.01 + 0.99*softplus(.)
    # deterministic path -> n_z_samples = 1 leading dim
    return loc[None], scale[None]


# ---- pure-JAX reference (for correctness check) -------------------------------
def reference_forward(X_cntxt, Y_cntxt, X_trgt, p):
    def mlp1(x):  # x_encoder
        return _relu(x @ p["wxe1"] + p["bxe1"]) @ p["wxe2"] + p["bxe2"]
    x_c = mlp1(X_cntxt)
    x_t = mlp1(X_trgt)
    h = _relu(x_c + (Y_cntxt @ p["wyr"] + p["byr"]))
    h = _relu(h @ p["wxy1"] + p["bxy1"])
    h = _relu(h @ p["wxy2"] + p["bxy2"])
    R = (h @ p["wxy3"] + p["bxy3"]).mean(axis=1, keepdims=True)  # [B,1,r]
    h = _relu(x_t + (R @ p["wres"] + p["bres"]))
    for i in range(1, 5):
        h = _relu(h @ p[f"wd{i}"] + p[f"bd{i}"])
    suff = h @ p["wd5"] + p["bd5"]
    loc = suff[..., :Y_DIM]
    scale = 0.01 + 0.99 * _softplus(suff[..., Y_DIM:])
    return loc[None], scale[None]


if __name__ == "__main__":
    key = jax.random.PRNGKey(0)
    k1, k2, k3, kp = jax.random.split(key, 4)
    # features must lie in [-1, 1]^d (module contract)
    X_cntxt = jax.random.uniform(k1, (B, N_CNTXT, X_DIM), jnp.float32, -1.0, 1.0)
    Y_cntxt = jax.random.normal(k2, (B, N_CNTXT, Y_DIM), jnp.float32)
    X_trgt = jax.random.uniform(k3, (B, N_TRGT, X_DIM), jnp.float32, -1.0, 1.0)
    params = init_params(kp)
    w_small, w_stack, b_stack = pack_params(params)

    loc, scale = neural_process_forward(X_cntxt, Y_cntxt, X_trgt,
                                        w_small, w_stack, b_stack)
    jax.block_until_ready((loc, scale))

    ref_loc, ref_scale = reference_forward(X_cntxt, Y_cntxt, X_trgt, params)
    assert loc.shape == (1, B, N_TRGT, Y_DIM) and scale.shape == (1, B, N_TRGT, Y_DIM)
    assert jnp.allclose(loc, ref_loc, atol=1e-4, rtol=1e-4)
    assert jnp.allclose(scale, ref_scale, atol=1e-4, rtol=1e-4)
    assert bool(jnp.all(scale > 0.01 - 1e-6))
    print("KERNEL_OK")
</pallas_src>

<mosaic_0001>
module attributes {stable_mosaic.version = 11 : i64} {
  func.func @kernel(%arg0: memref<32x2xf32, #tpu.memory_space<vmem>>, %arg1: memref<32x1xf32, #tpu.memory_space<vmem>>, %arg2: memref<32x2xf32, #tpu.memory_space<vmem>>, %arg3: memref<3x32xf32, #tpu.memory_space<vmem>>, %arg4: memref<9x32x32xf32, #tpu.memory_space<vmem>>, %arg5: memref<11x32xf32, #tpu.memory_space<vmem>>, %arg6: memref<32x32xf32, #tpu.memory_space<vmem>>) attributes {dimension_semantics = [], scalar_prefetch = 0 : i64, scratch_operands = 0 : i64, tpu.core_type = #tpu.core_type<tc>} {
    %c0 = arith.constant 0 : index
    %c0_0 = arith.constant 0 : index
    %0 = vector.load %arg3[%c0, %c0_0] : memref<3x32xf32, #tpu.memory_space<vmem>>, vector<3x32xf32>
    %c0_1 = arith.constant 0 : index
    %c0_2 = arith.constant 0 : index
    %1 = vector.load %arg5[%c0_1, %c0_2] : memref<11x32xf32, #tpu.memory_space<vmem>>, vector<11x32xf32>
    %c0_3 = arith.constant 0 : index
    %c0_4 = arith.constant 0 : index
    %2 = vector.load %arg0[%c0_3, %c0_4] : memref<32x2xf32, #tpu.memory_space<vmem>>, vector<32x2xf32>
    %c0_5 = arith.constant 0 : index
    %c0_6 = arith.constant 0 : index
    %3 = vector.load %arg1[%c0_5, %c0_6] : memref<32x1xf32, #tpu.memory_space<vmem>>, vector<32x1xf32>
    %c0_7 = arith.constant 0 : index
    %c0_8 = arith.constant 0 : index
    %4 = vector.load %arg2[%c0_7, %c0_8] : memref<32x2xf32, #tpu.memory_space<vmem>>, vector<32x2xf32>
    %5 = tpu.concatenate %2, %4 in 0 : vector<32x2xf32>, vector<32x2xf32> -> vector<64x2xf32>
    %6 = vector.extract_strided_slice %1 {offsets = [0, 0], sizes = [1, 32], strides = [1, 1]} : vector<11x32xf32> to vector<1x32xf32>
    %7 = vector.extract_strided_slice %5 {offsets = [0, 0], sizes = [64, 1], strides = [1, 1]} : vector<64x2xf32> to vector<64x1xf32>
    %8 = vector.extract_strided_slice %0 {offsets = [0, 0], sizes = [1, 32], strides = [1, 1]} : vector<3x32xf32> to vector<1x32xf32>
    %9 = vector.broadcast %7 : vector<64x1xf32> to vector<64x32xf32>
    %10 = vector.broadcast %8 : vector<1x32xf32> to vector<64x32xf32>
    %11 = arith.mulf %9, %10 : vector<64x32xf32>
    %12 = vector.broadcast %6 : vector<1x32xf32> to vector<64x32xf32>
    %13 = arith.addf %12, %11 : vector<64x32xf32>
    %14 = vector.extract_strided_slice %5 {offsets = [0, 1], sizes = [64, 1], strides = [1, 1]} : vector<64x2xf32> to vector<64x1xf32>
    %15 = vector.extract_strided_slice %0 {offsets = [1, 0], sizes = [1, 32], strides = [1, 1]} : vector<3x32xf32> to vector<1x32xf32>
    %16 = vector.broadcast %14 : vector<64x1xf32> to vector<64x32xf32>
    %17 = vector.broadcast %15 : vector<1x32xf32> to vector<64x32xf32>
    %18 = arith.mulf %16, %17 : vector<64x32xf32>
    %19 = arith.addf %13, %18 : vector<64x32xf32>
    %cst = arith.constant 0.000000e+00 : f32
    %20 = vector.broadcast %cst : f32 to vector<64x32xf32>
    %21 = arith.maximumf %19, %20 : vector<64x32xf32>
    %c0_9 = arith.constant 0 : index
    %c0_10 = arith.constant 0 : index
    %c0_11 = arith.constant 0 : index
    %22 = vector.load %arg4[%c0_9, %c0_10, %c0_11] : memref<9x32x32xf32, #tpu.memory_space<vmem>>, vector<1x32x32xf32>
    %23 = vector.shape_cast %22 : vector<1x32x32xf32> to vector<32x32xf32>
    %cst_12 = arith.constant dense<0.000000e+00> : vector<64x32xf32>
    %24 = tpu.matmul %21, %23, %cst_12 {dimension_numbers = #tpu.dot_dimension_numbers<[1], [0], [0], [1], [0, 0, 1, 1], [], []>} : vector<64x32xf32>, vector<32x32xf32>, vector<64x32xf32> -> vector<64x32xf32>
    %25 = vector.extract_strided_slice %1 {offsets = [1, 0], sizes = [1, 32], strides = [1, 1]} : vector<11x32xf32> to vector<1x32xf32>
    %26 = vector.broadcast %25 : vector<1x32xf32> to vector<64x32xf32>
    %27 = arith.addf %24, %26 : vector<64x32xf32>
    %28 = vector.extract_strided_slice %27 {offsets = [0, 0], sizes = [32, 32], strides = [1, 1]} : vector<64x32xf32> to vector<32x32xf32>
    %29 = vector.extract_strided_slice %27 {offsets = [32, 0], sizes = [32, 32], strides = [1, 1]} : vector<64x32xf32> to vector<32x32xf32>
    %30 = vector.extract_strided_slice %1 {offsets = [2, 0], sizes = [1, 32], strides = [1, 1]} : vector<11x32xf32> to vector<1x32xf32>
    %31 = vector.extract_strided_slice %0 {offsets = [2, 0], sizes = [1, 32], strides = [1, 1]} : vector<3x32xf32> to vector<1x32xf32>
    %32 = vector.broadcast %3 : vector<32x1xf32> to vector<32x32xf32>
    %33 = vector.broadcast %31 : vector<1x32xf32> to vector<32x32xf32>
    %34 = arith.mulf %32, %33 : vector<32x32xf32>
    %35 = vector.broadcast %30 : vector<1x32xf32> to vector<32x32xf32>
    %36 = arith.addf %35, %34 : vector<32x32xf32>
    %37 = arith.addf %28, %36 : vector<32x32xf32>
    %cst_13 = arith.constant 0.000000e+00 : f32
    %38 = vector.broadcast %cst_13 : f32 to vector<32x32xf32>
    %39 = arith.maximumf %37, %38 : vector<32x32xf32>
    %c1 = arith.constant 1 : index
    %c0_14 = arith.constant 0 : index
    %c0_15 = arith.constant 0 : index
    %40 = vector.load %arg4[%c1, %c0_14, %c0_15] : memref<9x32x32xf32, #tpu.memory_space<vmem>>, vector<1x32x32xf32>
    %41 = vector.shape_cast %40 : vector<1x32x32xf32> to vector<32x32xf32>
    %cst_16 = arith.constant dense<0.000000e+00> : vector<32x32xf32>
    %42 = tpu.matmul %39, %41, %cst_16 {dimension_numbers = #tpu.dot_dimension_numbers<[1], [0], [0], [1], [0, 0, 1, 1], [], []>} : vector<32x32xf32>, vector<32x32xf32>, vector<32x32xf32> -> vector<32x32xf32>
    %43 = vector.extract_strided_slice %1 {offsets = [3, 0], sizes = [1, 32], strides = [1, 1]} : vector<11x32xf32> to vector<1x32xf32>
    %44 = vector.broadcast %43 : vector<1x32xf32> to vector<32x32xf32>
    %45 = arith.addf %42, %44 : vector<32x32xf32>
    %cst_17 = arith.constant 0.000000e+00 : f32
    %46 = vector.broadcast %cst_17 : f32 to vector<32x32xf32>
    %47 = arith.maximumf %45, %46 : vector<32x32xf32>
    %c2 = arith.constant 2 : index
    %c0_18 = arith.constant 0 : index
    %c0_19 = arith.constant 0 : index
    %48 = vector.load %arg4[%c2, %c0_18, %c0_19] : memref<9x32x32xf32, #tpu.memory_space<vmem>>, vector<1x32x32xf32>
    %49 = vector.shape_cast %48 : vector<1x32x32xf32> to vector<32x32xf32>
    %cst_20 = arith.constant dense<0.000000e+00> : vector<32x32xf32>
    %50 = tpu.matmul %47, %49, %cst_20 {dimension_numbers = #tpu.dot_dimension_numbers<[1], [0], [0], [1], [0, 0, 1, 1], [], []>} : vector<32x32xf32>, vector<32x32xf32>, vector<32x32xf32> -> vector<32x32xf32>
    %51 = vector.extract_strided_slice %1 {offsets = [4, 0], sizes = [1, 32], strides = [1, 1]} : vector<11x32xf32> to vector<1x32xf32>
    %52 = vector.broadcast %51 : vector<1x32xf32> to vector<32x32xf32>
    %53 = arith.addf %50, %52 : vector<32x32xf32>
    %cst_21 = arith.constant 0.000000e+00 : f32
    %54 = vector.broadcast %cst_21 : f32 to vector<32x32xf32>
    %55 = arith.maximumf %53, %54 : vector<32x32xf32>
    %c3 = arith.constant 3 : index
    %c0_22 = arith.constant 0 : index
    %c0_23 = arith.constant 0 : index
    %56 = vector.load %arg4[%c3, %c0_22, %c0_23] : memref<9x32x32xf32, #tpu.memory_space<vmem>>, vector<1x32x32xf32>
    %57 = vector.shape_cast %56 : vector<1x32x32xf32> to vector<32x32xf32>
    %cst_24 = arith.constant dense<0.000000e+00> : vector<32x32xf32>
    %58 = tpu.matmul %55, %57, %cst_24 {dimension_numbers = #tpu.dot_dimension_numbers<[1], [0], [0], [1], [0, 0, 1, 1], [], []>} : vector<32x32xf32>, vector<32x32xf32>, vector<32x32xf32> -> vector<32x32xf32>
    %59 = vector.extract_strided_slice %58 {offsets = [0, 0], sizes = [16, 32], strides = [1, 1]} : vector<32x32xf32> to vector<16x32xf32>
    %cst_25 = arith.constant dense<0.000000e+00> : vector<32xf32>
    %60 = vector.multi_reduction <add>, %59, %cst_25 [0] : vector<16x32xf32> to vector<32xf32>
    %61 = vector.shape_cast %60 : vector<32xf32> to vector<1x32xf32>
    %cst_26 = arith.constant 1.600000e+01 : f32
    %62 = vector.broadcast %cst_26 : f32 to vector<1x32xf32>
    %63 = arith.divf %61, %62 : vector<1x32xf32>
    %64 = vector.extract_strided_slice %1 {offsets = [5, 0], sizes = [1, 32], strides = [1, 1]} : vector<11x32xf32> to vector<1x32xf32>
    %65 = arith.addf %63, %64 : vector<1x32xf32>
    %66 = vector.extract_strided_slice %29 {offsets = [0, 0], sizes = [16, 32], strides = [1, 1]} : vector<32x32xf32> to vector<16x32xf32>
    %67 = vector.broadcast %65 : vector<1x32xf32> to vector<16x32xf32>
    %68 = arith.addf %66, %67 : vector<16x32xf32>
    %cst_27 = arith.constant 0.000000e+00 : f32
    %69 = vector.broadcast %cst_27 : f32 to vector<16x32xf32>
    %70 = arith.maximumf %68, %69 : vector<16x32xf32>
    %71 = vector.extract_strided_slice %58 {offsets = [16, 0], sizes = [16, 32], strides = [1, 1]} : vector<32x32xf32> to vector<16x32xf32>
    %cst_28 = arith.constant dense<0.000000e+00> : vector<32xf32>
    %72 = vector.multi_reduction <add>, %71, %cst_28 [0] : vector<16x32xf32> to vector<32xf32>
    %73 = vector.shape_cast %72 : vector<32xf32> to vector<1x32xf32>
    %cst_29 = arith.constant 1.600000e+01 : f32
    %74 = vector.broadcast %cst_29 : f32 to vector<1x32xf32>
    %75 = arith.divf %73, %74 : vector<1x32xf32>
    %76 = vector.extract_strided_slice %1 {offsets = [5, 0], sizes = [1, 32], strides = [1, 1]} : vector<11x32xf32> to vector<1x32xf32>
    %77 = arith.addf %75, %76 : vector<1x32xf32>
    %78 = vector.extract_strided_slice %29 {offsets = [16, 0], sizes = [16, 32], strides = [1, 1]} : vector<32x32xf32> to vector<16x32xf32>
    %79 = vector.broadcast %77 : vector<1x32xf32> to vector<16x32xf32>
    %80 = arith.addf %78, %79 : vector<16x32xf32>
    %cst_30 = arith.constant 0.000000e+00 : f32
    %81 = vector.broadcast %cst_30 : f32 to vector<16x32xf32>
    %82 = arith.maximumf %80, %81 : vector<16x32xf32>
    %83 = tpu.concatenate %70, %82 in 0 : vector<16x32xf32>, vector<16x32xf32> -> vector<32x32xf32>
    %c4 = arith.constant 4 : index
    %c0_31 = arith.constant 0 : index
    %c0_32 = arith.constant 0 : index
    %84 = vector.load %arg4[%c4, %c0_31, %c0_32] : memref<9x32x32xf32, #tpu.memory_space<vmem>>, vector<1x32x32xf32>
    %85 = vector.shape_cast %84 : vector<1x32x32xf32> to vector<32x32xf32>
    %cst_33 = arith.constant dense<0.000000e+00> : vector<32x32xf32>
    %86 = tpu.matmul %83, %85, %cst_33 {dimension_numbers = #tpu.dot_dimension_numbers<[1], [0], [0], [1], [0, 0, 1, 1], [], []>} : vector<32x32xf32>, vector<32x32xf32>, vector<32x32xf32> -> vector<32x32xf32>
    %87 = vector.extract_strided_slice %1 {offsets = [6, 0], sizes = [1, 32], strides = [1, 1]} : vector<11x32xf32> to vector<1x32xf32>
    %88 = vector.broadcast %87 : vector<1x32xf32> to vector<32x32xf32>
    %89 = arith.addf %86, %88 : vector<32x32xf32>
    %cst_34 = arith.constant 0.000000e+00 : f32
    %90 = vector.broadcast %cst_34 : f32 to vector<32x32xf32>
    %91 = arith.maximumf %89, %90 : vector<32x32xf32>
    %c5 = arith.constant 5 : index
    %c0_35 = arith.constant 0 : index
    %c0_36 = arith.constant 0 : index
    %92 = vector.load %arg4[%c5, %c0_35, %c0_36] : memref<9x32x32xf32, #tpu.memory_space<vmem>>, vector<1x32x32xf32>
    %93 = vector.shape_cast %92 : vector<1x32x32xf32> to vector<32x32xf32>
    %cst_37 = arith.constant dense<0.000000e+00> : vector<32x32xf32>
    %94 = tpu.matmul %91, %93, %cst_37 {dimension_numbers = #tpu.dot_dimension_numbers<[1], [0], [0], [1], [0, 0, 1, 1], [], []>} : vector<32x32xf32>, vector<32x32xf32>, vector<32x32xf32> -> vector<32x32xf32>
    %95 = vector.extract_strided_slice %1 {offsets = [7, 0], sizes = [1, 32], strides = [1, 1]} : vector<11x32xf32> to vector<1x32xf32>
    %96 = vector.broadcast %95 : vector<1x32xf32> to vector<32x32xf32>
    %97 = arith.addf %94, %96 : vector<32x32xf32>
    %cst_38 = arith.constant 0.000000e+00 : f32
    %98 = vector.broadcast %cst_38 : f32 to vector<32x32xf32>
    %99 = arith.maximumf %97, %98 : vector<32x32xf32>
    %c6 = arith.constant 6 : index
    %c0_39 = arith.constant 0 : index
    %c0_40 = arith.constant 0 : index
    %100 = vector.load %arg4[%c6, %c0_39, %c0_40] : memref<9x32x32xf32, #tpu.memory_space<vmem>>, vector<1x32x32xf32>
    %101 = vector.shape_cast %100 : vector<1x32x32xf32> to vector<32x32xf32>
    %cst_41 = arith.constant dense<0.000000e+00> : vector<32x32xf32>
    %102 = tpu.matmul %99, %101, %cst_41 {dimension_numbers = #tpu.dot_dimension_numbers<[1], [0], [0], [1], [0, 0, 1, 1], [], []>} : vector<32x32xf32>, vector<32x32xf32>, vector<32x32xf32> -> vector<32x32xf32>
    %103 = vector.extract_strided_slice %1 {offsets = [8, 0], sizes = [1, 32], strides = [1, 1]} : vector<11x32xf32> to vector<1x32xf32>
    %104 = vector.broadcast %103 : vector<1x32xf32> to vector<32x32xf32>
    %105 = arith.addf %102, %104 : vector<32x32xf32>
    %cst_42 = arith.constant 0.000000e+00 : f32
    %106 = vector.broadcast %cst_42 : f32 to vector<32x32xf32>
    %107 = arith.maximumf %105, %106 : vector<32x32xf32>
    %c7 = arith.constant 7 : index
    %c0_43 = arith.constant 0 : index
    %c0_44 = arith.constant 0 : index
    %108 = vector.load %arg4[%c7, %c0_43, %c0_44] : memref<9x32x32xf32, #tpu.memory_space<vmem>>, vector<1x32x32xf32>
    %109 = vector.shape_cast %108 : vector<1x32x32xf32> to vector<32x32xf32>
    %cst_45 = arith.constant dense<0.000000e+00> : vector<32x32xf32>
    %110 = tpu.matmul %107, %109, %cst_45 {dimension_numbers = #tpu.dot_dimension_numbers<[1], [0], [0], [1], [0, 0, 1, 1], [], []>} : vector<32x32xf32>, vector<32x32xf32>, vector<32x32xf32> -> vector<32x32xf32>
    %111 = vector.extract_strided_slice %1 {offsets = [9, 0], sizes = [1, 32], strides = [1, 1]} : vector<11x32xf32> to vector<1x32xf32>
    %112 = vector.broadcast %111 : vector<1x32xf32> to vector<32x32xf32>
    %113 = arith.addf %110, %112 : vector<32x32xf32>
    %cst_46 = arith.constant 0.000000e+00 : f32
    %114 = vector.broadcast %cst_46 : f32 to vector<32x32xf32>
    %115 = arith.maximumf %113, %114 : vector<32x32xf32>
    %c8 = arith.constant 8 : index
    %c0_47 = arith.constant 0 : index
    %c0_48 = arith.constant 0 : index
    %116 = vector.load %arg4[%c8, %c0_47, %c0_48] : memref<9x32x32xf32, #tpu.memory_space<vmem>>, vector<1x32x32xf32>
    %117 = vector.shape_cast %116 : vector<1x32x32xf32> to vector<32x32xf32>
    %cst_49 = arith.constant dense<0.000000e+00> : vector<32x32xf32>
    %118 = tpu.matmul %115, %117, %cst_49 {dimension_numbers = #tpu.dot_dimension_numbers<[1], [0], [0], [1], [0, 0, 1, 1], [], []>} : vector<32x32xf32>, vector<32x32xf32>, vector<32x32xf32> -> vector<32x32xf32>
    %119 = vector.extract_strided_slice %1 {offsets = [10, 0], sizes = [1, 32], strides = [1, 1]} : vector<11x32xf32> to vector<1x32xf32>
    %120 = vector.broadcast %119 : vector<1x32xf32> to vector<32x32xf32>
    %121 = arith.addf %118, %120 : vector<32x32xf32>
    %122 = tpu.iota {dimensions = array<i32: 1>} : vector<32x32xi32>
    %c1_i32 = arith.constant 1 : i32
    %123 = vector.broadcast %c1_i32 : i32 to vector<32x32xi32>
    %124 = arith.cmpi slt, %122, %123 : vector<32x32xi32>
    %cst_50 = arith.constant 0.000000e+00 : f32
    %125 = vector.broadcast %cst_50 : f32 to vector<32x32xf32>
    %126 = arith.maximumf %121, %125 : vector<32x32xf32>
    %127 = math.absf %121 : vector<32x32xf32>
    %cst_51 = arith.constant 0.000000e+00 : f32
    %128 = vector.broadcast %cst_51 : f32 to vector<32x32xf32>
    %129 = arith.subf %128, %127 : vector<32x32xf32>
    %130 = math.exp %129 : vector<32x32xf32>
    %131 = math.log1p %130 : vector<32x32xf32>
    %132 = arith.addf %126, %131 : vector<32x32xf32>
    %cst_52 = arith.constant 9.900000e-01 : f32
    %133 = vector.broadcast %cst_52 : f32 to vector<32x32xf32>
    %134 = arith.mulf %133, %132 : vector<32x32xf32>
    %cst_53 = arith.constant 0.00999999977 : f32
    %135 = vector.broadcast %cst_53 : f32 to vector<32x32xf32>
    %136 = arith.addf %135, %134 : vector<32x32xf32>
    %137 = arith.select %124, %121, %136 : vector<32x32xi1>, vector<32x32xf32>
    %c0_54 = arith.constant 0 : index
    %c0_55 = arith.constant 0 : index
    %138 = vector.load %arg6[%c0_54, %c0_55] : memref<32x32xf32, #tpu.memory_space<vmem>>, vector<32x32xf32>
    tpu.vector_store %arg6[%c0_54, %c0_55], %137 {strides = array<i32>} : memref<32x32xf32, #tpu.memory_space<vmem>>, vector<32x32xf32>,
    return
  }
}

</mosaic_0001>

<bundles_post_ra>
// kernel: neural_process_forward.1
= control target key start
LH: loop header
LB: loop body
LE: loop exit
PB: predicated region body
PF: predicated region fallthrough
CT: control target
= control target key end

     0   :  { %11 = vsyncpa [#allocation3], 0  ;;  %s911_s24 = smov [#allocation2]   ;;  %s912_s26 = smov 128   ;;  %s1136_s0 = inlined_call_operand.vmem [shape: f32[32,2], index: 0, kind: input, shape index: {}]   ;;  %s1137_s1 = inlined_call_operand.vmem [shape: f32[32,1], index: 1, kind: input, shape index: {}]   ;;  %s1138_s2 = inlined_call_operand.vmem [shape: f32[32,2], index: 2, kind: input, shape index: {}]   ;;  %s1139_s3 = inlined_call_operand.vmem [shape: f32[3,32], index: 3, kind: input, shape index: {}]   ;;  %s1140_s4 = inlined_call_operand.hbm [shape: f32[9,32,32], index: 4, kind: input, shape index: {}]   ;;  %s1141_s5 = inlined_call_operand.vmem [shape: f32[11,32], index: 5, kind: input, shape index: {}]   ;;  %s1142_s6 = inlined_call_operand.vmem [shape: f32[32,32], index: 6, kind: output, shape index: {}]  }
   0x1   :  { %s24_s23 = sshll.u32 %s1140_s4, 4  ;;  %s26_s25 = sshll.u32 %s911_s24, 4  ;;  %s25_s23 = int_to_ptr.hbm [resolvable:$true] %s24_s23  ;;  %s27_s25 = int_to_ptr.vmem [resolvable:$true] %s26_s25 }
   0x2   :  { %s913_s27 = smov 8  }
   0x3   :  { %32 = dma.hbm_to_vmem [thread:$0]  %s25_s23, 4608, %s27_s25, [#allocation3], %s912_s26, %s912_s26, %s913_s27  }
   0x4   :  { %909 = dma.done.wait [#allocation3], 4608  }
   0x5   :  { %910 = vsyncadd [#allocation3], 4294962688  ;;  %v914_v0 = vmov 0   ;;  %v43_v1 = vld [vmem:[%s1136_s0 + $0x8] sm:$0xff]  ;;  %v42_v2 = vld [vmem:[%s1136_s0] sm:$0xff]  ;;  %v915_v4 = vmov 1  }
   0x6   :  { %856 = vset.pattern.permute.xlu1 %v914_v0  ;;  %854 = vset.pattern.permute.xlu0 %v914_v0  ;;  %v44_v3 = vld [vmem:[%s1136_s0 + $0x10] sm:$0xff]  ;;  %v45_v5 = vld [vmem:[%s1136_s0 + $0x18] sm:$0xff]  ;;  %v46_v6 = vld [vmem:[%s1137_s1] sm:$0xff]  ;;  %vm174_vm0 = vcmask 261120  }
   0x7   :  { %858 = vset.pattern.permute.xlu2 %v914_v0  ;;  %61 = vperm.xlu1 %856, %v43_v1   ;;  %v47_v7 = vld [vmem:[%s1137_s1 + $0x8] sm:$0xff]  ;;  %v52_v8 = vld [vmem:[%s1138_s2 + $0x10] sm:$0xff]  ;;  %v49_v10 = vld [vmem:[%s1137_s1 + $0x18] sm:$0xff] }
   0x8   :  { %56 = vperm.xlu0 %854, %v42_v2   ;;  %66 = vperm.xlu2 %858, %v44_v3   ;;  %v48_v9 = vld [vmem:[%s1137_s1 + $0x10] sm:$0xff]  ;;  %v53_v11 = vld [vmem:[%s1138_s2 + $0x18] sm:$0xff]  ;;  %v50_v12 = vld [vmem:[%s1138_s2] sm:$0xff] }
   0x9   :  { %v172_v13 = vld [vmem:[#allocation2 + $0x18] sm:$0xff]  ;;  %v171_v15 = vld [vmem:[#allocation2 + $0x10] sm:$0xff]  ;;  %v170_v16 = vld [vmem:[#allocation2 + $0x8] sm:$0xff] }
   0xa   :  { %211 = vmatpush.msra.mxu0 %v172_v13  ;;  %840 = vmatpush.msra.mxu2 %v172_v13  ;;  %v169_v17 = vld [vmem:[#allocation2] sm:$0xff] }
   0xb   :  { %v39_v20 = vld [vmem:[%s1139_s3] sm:$0x7] }
   0xc   :  { %212 = vmatpush.msra.mxu0 %v171_v15  ;;  %841 = vmatpush.msra.mxu2 %v171_v15  ;;  %v991_v23 = vperm.slane %v39_v20, 0  ;;  %v996_v24 = vld [vmem:[%s1141_s5] sm:$0xff]  ;;  %v260_v25 = vperm.slane %v39_v20, 2  ;;  %v1004_v30 = vperm.slane %v39_v20, 1 }
   0xd   :  { %v1002_v29 = vperm.slane %v996_v24, 0  ;;  %v265_v20 = vperm.slane %v996_v24, 2 }
   0xe   :  { %213 = vmatpush.msra.mxu0 %v170_v16  ;;  %842 = vmatpush.msra.mxu2 %v170_v16  ;;  %v282_v16 = vld [vmem:[#allocation2 + $0x38] sm:$0xff] }
   0xf   :  { %857 = vset.pattern.permute.xlu1 %v915_v4  ;;  %308 = vmatpush.msra.mxu1 %v282_v16 }
  0x10   :  { %855 = vset.pattern.permute.xlu0 %v915_v4  ;;  %117 = vperm.xlu1 %857, %v43_v1  }
  0x11   :  { %113 = vperm.xlu0 %855, %v42_v2   ;;  %859 = vset.pattern.permute.xlu2 %v915_v4 }
  0x12   :  { %121 = vperm.xlu2 %859, %v44_v3   ;;  %214 = vmatpush.msra.mxu0 %v169_v17 }
  0x13   :  { %843 = vmatpush.msra.mxu2 %v169_v17  ;;  %844 = vmatpush.msra.mxu3 %v282_v16  ;;  %v281_v17 = vld [vmem:[#allocation2 + $0x30] sm:$0xff] }
  0x14   :  { %309 = vmatpush.msra.mxu1 %v281_v17 }
  0x15   :  { %845 = vmatpush.msra.mxu3 %v281_v17 }
  0x18   :  { %860 = vset.pattern.permute.xlu1 %v914_v0 }
  0x19   :  { %861 = vset.pattern.permute.xlu0 %v914_v0  ;;  %71 = vperm.xlu1 %860, %v45_v5  }
  0x1a   :  { %242 = vperm.xlu0 %861, %v46_v6   ;;  %125 = vperm.xlu2 %859, %v45_v5  }
  0x21   :  { %247 = vperm.xlu1 %860, %v47_v7  }
  0x22   :  { %863 = vset.pattern.permute.xlu0 %v915_v4  ;;  %862 = vset.pattern.permute.xlu2 %v914_v0 }
  0x23   :  { %137 = vperm.xlu0 %863, %v52_v8   ;;  %252 = vperm.xlu2 %862, %v48_v9  }
  0x29   :  { %257 = vperm.xlu1 %860, %v49_v10  }
  0x2b   :  { %865 = vset.pattern.permute.xlu0 %v914_v0  ;;  %86 = vperm.xlu2 %862, %v52_v8  }
  0x31   :  { %91 = vperm.xlu1 %860, %v53_v11  }
  0x33   :  { %864 = vset.pattern.permute.xlu2 %v915_v4 }
  0x34   :  { %141 = vperm.xlu2 %864, %v53_v11  }
  0x39   :  { %76 = vperm.xlu1 %860, %v50_v12  }
  0x3c   :  { %129 = vperm.xlu2 %864, %v50_v12  }
  0x41   :  { %866 = vset.pattern.permute.xlu1 %v915_v4 }
  0x62   :  { %v67_v14 = vpop.permute.xlu2 %66 }
  0x63   :  { %v97_v40 = vmul.f32 %v991_v23, %v67_v14 }
  0x65   :  { %v106_v46 = vadd.f32 %v1002_v29, %v97_v40 }
  0x6c   :  { %v122_v18 = vpop.permute.xlu2 %121 }
  0x6d   :  { %v147_v47 = vmul.f32 %v1004_v30, %v122_v18  ;;  %v280_v18 = vld [vmem:[#allocation2 + $0x28] sm:$0xff] }
  0x6e   :  { %310 = vmatpush.msra.mxu1 %v280_v18  ;;  %846 = vmatpush.msra.mxu3 %v280_v18 }
  0x6f   :  { %v155_v50 = vadd.f32 %v147_v47, %v106_v46 }
  0x71   :  { %v163_v57 = vmax.f32 %v155_v50, 0.0  ;;  %v283_v50 = vperm.slane %v996_v24, 3 }
  0x74   :  { %v126_v19 = vpop.permute.xlu2 %125 }
  0x75   :  { %v148_v58 = vmul.f32 %v1004_v30, %v126_v19  ;;  %v279_v19 = vld [vmem:[#allocation2 + $0x20] sm:$0xff] }
  0x76   :  { %311 = vmatpush.msra.mxu1 %v279_v19  ;;  %847 = vmatpush.msra.mxu3 %v279_v19 }
  0x79   :  { %v62_v22 = vpop.permute.xlu1 %61 }
  0x7a   :  { %v57_v21 = vpop.permute.xlu0 %56  ;;  %v96_v34 = vmul.f32 %v991_v23, %v62_v22 }
  0x7b   :  { %v95_v28 = vmul.f32 %v991_v23, %v57_v21  ;;  %v1035_v21 = vperm.slane %v996_v24, 1 }
  0x7c   :  { %v105_v37 = vadd.f32 %v1002_v29, %v96_v34 }
  0x7d   :  { %v253_v26 = vpop.permute.xlu2 %252  ;;  %v104_v33 = vadd.f32 %v1002_v29, %v95_v28 }
  0x7e   :  { %v998_v27 = vmul.f32 %v260_v25, %v253_v26 }
  0x82   :  { %v118_v32 = vpop.permute.xlu1 %117 }
  0x83   :  { %v114_v31 = vpop.permute.xlu0 %113  ;;  %v146_v39 = vmul.f32 %v1004_v30, %v118_v32 }
  0x84   :  { %v145_v35 = vmul.f32 %v1004_v30, %v114_v31 }
  0x85   :  { %v154_v41 = vadd.f32 %v146_v39, %v105_v37  ;;  %v87_v45 = vpop.permute.xlu2 %86  ;;  %v332_v37 = vld [vmem:[#allocation2 + $0x50] sm:$0xff]  ;;  %v268_v39 = vadd.f32 %v265_v20, %v998_v27  ;;  %v330_v27 = vld [vmem:[#allocation2 + $0x40] sm:$0xff] }
  0x86   :  { %v153_v36 = vadd.f32 %v145_v35, %v104_v33  ;;  %v101_v49 = vmul.f32 %v991_v23, %v87_v45 }
  0x87   :  { %v162_v48 = vmax.f32 %v154_v41, 0.0 }
  0x88   :  { %v161_v38 = vmax.f32 %v153_v36, 0.0  ;;  %v110_v53 = vadd.f32 %v1002_v29, %v101_v49  ;;  %v333_v36 = vld [vmem:[#allocation2 + $0x58] sm:$0xff]  ;;  %v331_v49 = vld [vmem:[#allocation2 + $0x48] sm:$0xff] }
  0x89   :  { %359 = vmatpush.msrb.mxu2 %v333_v36 }
  0x8a   :  { %800 = vmatmul.msk.f32.vlgmr.msra.gmra.mxu0 %vm174_vm0, %v161_v38 }
  0x8b   :  { %v72_v42 = vpop.permute.xlu1 %71  ;;  %360 = vmatpush.msrb.mxu2 %v332_v37 }
  0x8c   :  { %v243_v43 = vpop.permute.xlu0 %242  ;;  %v98_v51 = vmul.f32 %v991_v23, %v72_v42 }
  0x8d   :  { %v261_v44 = vmul.f32 %v260_v25, %v243_v43  ;;  %361 = vmatpush.msrb.mxu2 %v331_v49 }
  0x8e   :  { %v107_v59 = vadd.f32 %v1002_v29, %v98_v51  ;;  %v142_v2 = vpop.permute.xlu2 %141 }
  0x8f   :  { %v152_v5 = vmul.f32 %v1004_v30, %v142_v2  ;;  %v266_v22 = vadd.f32 %v265_v20, %v261_v44  ;;  %362 = vmatpush.msrb.mxu2 %v330_v27  ;;  %v382_v2 = vld [vmem:[#allocation2 + $0x68] sm:$0xff] }
  0x90   :  { %v156_v63 = vadd.f32 %v148_v58, %v107_v59 }
  0x92   :  { %801 = vmatmul.msk.f32.gmra.mxu0 %vm174_vm0, %v162_v48  ;;  %v164_v1 = vmax.f32 %v156_v63, 0.0 }
  0x93   :  { %v248_v52 = vpop.permute.xlu1 %247 }
  0x94   :  { %v262_v54 = vmul.f32 %v260_v25, %v248_v52 }
  0x95   :  { %v138_v55 = vpop.permute.xlu0 %137 }
  0x96   :  { %v151_v56 = vmul.f32 %v1004_v30, %v138_v55  ;;  %v130_v8 = vpop.permute.xlu2 %129  ;;  %v267_v33 = vadd.f32 %v265_v20, %v262_v54  ;;  %v51_v54 = vld [vmem:[%s1138_s2 + $0x8] sm:$0xff]  ;;  %v384_v55 = vld [vmem:[#allocation2 + $0x78] sm:$0xff] }
  0x97   :  { %v149_v12 = vmul.f32 %v1004_v30, %v130_v8  ;;  %81 = vperm.xlu0 %865, %v51_v54   ;;  %133 = vperm.xlu1 %866, %v51_v54   ;;  %v334_v8 = vperm.slane %v996_v24, 4 }
  0x98   :  { %v159_v60 = vadd.f32 %v151_v56, %v110_v53  ;;  %v383_v56 = vld [vmem:[#allocation2 + $0x70] sm:$0xff]  ;;  %409 = vmatpush.msrb.mxu3 %v384_v55 }
  0x9a   :  { %802 = vmatmul.msk.f32.gmra.mxu0 %vm174_vm0, %v163_v57  ;;  %v167_v61 = vmax.f32 %v159_v60, 0.0  ;;  %410 = vmatpush.msrb.mxu3 %v383_v56 }
  0x9b   :  { %v258_v62 = vpop.permute.xlu1 %257 }
  0x9c   :  { %806 = vmatmul.msk.f32.vlgmr.msra.gmra.mxu2 %vm174_vm0, %v167_v61  ;;  %v264_v0 = vmul.f32 %v260_v25, %v258_v62  ;;  %411 = vmatpush.msrb.mxu3 %v382_v2 }
  0x9e   :  { %v269_v45 = vadd.f32 %v265_v20, %v264_v0 }
  0xa2   :  { %803 = vmatmul.msk.f32.gmra.mxu0 %vm174_vm0, %v164_v1 }
  0xa3   :  { %v92_v3 = vpop.permute.xlu1 %91 }
  0xa4   :  { %v102_v4 = vmul.f32 %v991_v23, %v92_v3  ;;  %v381_v3 = vld [vmem:[#allocation2 + $0x60] sm:$0xff] }
  0xa5   :  { %412 = vmatpush.msrb.mxu3 %v381_v3  ;;  %v518_v3 = vld [vmem:[#allocation2 + $0xa8] sm:$0xff] }
  0xa6   :  { %v111_v6 = vadd.f32 %v1002_v29, %v102_v4 }
  0xa8   :  { %v160_v7 = vadd.f32 %v152_v5, %v111_v6 }
  0xaa   :  { %v168_v9 = vmax.f32 %v160_v7, 0.0 }
  0xab   :  { %v77_v10 = vpop.permute.xlu1 %76 }
  0xac   :  { %v99_v11 = vmul.f32 %v991_v23, %v77_v10  ;;  %807 = vmatmul.msk.f32.gmra.mxu2 %vm174_vm0, %v168_v9 }
  0xae   :  { %v108_v13 = vadd.f32 %v1002_v29, %v99_v11 }
  0xb0   :  { %v157_v14 = vadd.f32 %v149_v12, %v108_v13 }
  0xb2   :  { %v165_v15 = vmax.f32 %v157_v14, 0.0 }
  0xb4   :  { %804 = vmatmul.msk.f32.gmra.mxu0 %vm174_vm0, %v165_v15 }
 0x107   :  { %v216_v25 = vpop.f32.mrf.mxu0 }
 0x108   :  { %v217_v26 = vadd.f32 %v216_v25, %v1035_v21 }
 0x109   :  { %v82_v6 = vpop.permute.xlu0 %81  ;;  %v134_v10 = vpop.permute.xlu1 %133 }
 0x10a   :  { %v270_v28 = vadd.f32 %v266_v22, %v217_v26  ;;  %v100_v7 = vmul.f32 %v991_v23, %v82_v6  ;;  %v150_v12 = vmul.f32 %v1004_v30, %v134_v10  ;;  %v469_v26 = vld [vmem:[#allocation2 + $0x98] sm:$0xff] }
 0x10b   :  { %495 = vmatpush.msrb.mxu1 %v469_v26 }
 0x10c   :  { %v274_v31 = vmax.f32 %v270_v28, 0.0  ;;  %v109_v9 = vadd.f32 %v1002_v29, %v100_v7  ;;  %v916_v28 = vmov 16.0  }
 0x10d   :  { %867 = vrcp.f32 %v916_v28  ;;  %v570_v28 = vld [vmem:[#allocation2 + $0xd0] sm:$0xff] }
 0x10e   :  { %808 = vmatmul.msk.f32.vlgmr.msra.gmra.mxu1 %vm174_vm0, %v274_v31  ;;  %v158_v14 = vadd.f32 %v150_v12, %v109_v9  ;;  %v468_v31 = vld [vmem:[#allocation2 + $0x90] sm:$0xff] }
 0x10f   :  { %v219_v32 = vpop.f32.mrf.mxu0  ;;  %496 = vmatpush.msrb.mxu1 %v468_v31  ;;  %v569_v31 = vld [vmem:[#allocation2 + $0xc8] sm:$0xff] }
 0x110   :  { %v220_v34 = vadd.f32 %v219_v32, %v1035_v21  ;;  %v166_v16 = vmax.f32 %v158_v14, 0.0  ;;  %v467_v32 = vld [vmem:[#allocation2 + $0x88] sm:$0xff] }
 0x111   :  { %497 = vmatpush.msrb.mxu1 %v467_v32 }
 0x112   :  { %v271_v35 = vadd.f32 %v267_v33, %v220_v34  ;;  %805 = vmatmul.msk.f32.gmra.mxu0 %vm174_vm0, %v166_v16  ;;  %v466_v34 = vld [vmem:[#allocation2 + $0x80] sm:$0xff] }
 0x113   :  { %498 = vmatpush.msrb.mxu1 %v466_v34 }
 0x114   :  { %v275_v38 = vmax.f32 %v271_v35, 0.0  ;;  %v868_v35 = vpop.eup %867 }
 0x115   :  { %v436_v36 = vmul.f32 16.0, %v868_v35  ;;  %vm440_vm1 = vweird.f32 %v868_v35 }
 0x116   :  { %809 = vmatmul.msk.f32.gmra.mxu1 %vm174_vm0, %v275_v38 }
 0x117   :  { %v222_v40 = vpop.f32.mrf.mxu0 }
 0x118   :  { %v223_v41 = vadd.f32 %v222_v40, %v1035_v21  ;;  %v437_v40 = vsub.f32 1.0, %v436_v36 }
 0x11a   :  { %v272_v42 = vadd.f32 %v268_v39, %v223_v41 }
 0x11c   :  { %v276_v43 = vmax.f32 %v272_v42, 0.0 }
 0x11e   :  { %810 = vmatmul.msk.f32.vlgmr.msra.gmra.mxu3 %vm174_vm0, %v276_v43  ;;  %v438_v43 = vmul.f32 %v868_v35, %v437_v40  ;;  %v521_v40 = vperm.slane %v996_v24, 7 }
 0x11f   :  { %v225_v44 = vpop.f32.mrf.mxu0  ;;  %v1054_v4 = vpop.f32.mrf.mxu2 }
 0x120   :  { %v226_v46 = vadd.f32 %v225_v44, %v1035_v21 }
 0x122   :  { %v273_v47 = vadd.f32 %v269_v45, %v226_v46  ;;  %v439_v46 = vadd.f32 %v868_v35, %v438_v43 }
 0x124   :  { %v277_v48 = vmax.f32 %v273_v47, 0.0  ;;  %v441_v27 = vsel %vm440_vm1, %v868_v35, %v439_v46  ;;  %v620_v46 = vld [vmem:[#allocation2 + $0xe8] sm:$0xff] }
 0x126   :  { %811 = vmatmul.msk.f32.gmra.mxu3 %vm174_vm0, %v277_v48 }
 0x12f   :  { %v1056_v5 = vpop.f32.mrf.mxu2 }
 0x131   :  { %v228_v49 = vpop.f32.mrf.mxu0 }
 0x132   :  { %v229_v54 = vadd.f32 %v228_v49, %v1035_v21 }
 0x18b   :  { %v313_v51 = vpop.f32.mrf.mxu1 }
 0x18c   :  { %v314_v52 = vadd.f32 %v313_v51, %v283_v50 }
 0x18e   :  { %v325_v53 = vmax.f32 %v314_v52, 0.0 }
 0x18f   :  { %v231_v56 = vpop.f32.mrf.mxu0 }
 0x190   :  { %812 = vmatmul.msk.f32.vlgmr.msrb.gmra.mxu2 %vm174_vm0, %v325_v53 }
 0x193   :  { %v316_v57 = vpop.f32.mrf.mxu1 }
 0x194   :  { %v317_v58 = vadd.f32 %v316_v57, %v283_v50 }
 0x196   :  { %v326_v59 = vmax.f32 %v317_v58, 0.0 }
 0x198   :  { %813 = vmatmul.msk.f32.gmra.mxu2 %vm174_vm0, %v326_v59 }
 0x1a1   :  { %v319_v60 = vpop.f32.mrf.mxu3 }
 0x1a2   :  { %v320_v61 = vadd.f32 %v319_v60, %v283_v50 }
 0x1a4   :  { %v327_v62 = vmax.f32 %v320_v61, 0.0  ;;  %v232_v61 = vadd.f32 %v231_v56, %v1035_v21 }
 0x1a6   :  { %814 = vmatmul.msk.f32.gmra.mxu2 %vm174_vm0, %v327_v62 }
 0x1a9   :  { %v322_v63 = vpop.f32.mrf.mxu3 }
 0x1aa   :  { %v323_v0 = vadd.f32 %v322_v63, %v283_v50 }
 0x1ac   :  { %v328_v1 = vmax.f32 %v323_v0, 0.0  ;;  %v520_v0 = vld [vmem:[#allocation2 + $0xb8] sm:$0xff] }
 0x1ad   :  { %546 = vmatpush.msra.mxu2 %v520_v0 }
 0x1ae   :  { %815 = vmatmul.msk.f32.gmra.mxu2 %vm174_vm0, %v328_v1  ;;  %v519_v1 = vld [vmem:[#allocation2 + $0xb0] sm:$0xff] }
 0x1af   :  { %547 = vmatpush.msra.mxu2 %v519_v1 }
 0x1b1   :  { %548 = vmatpush.msra.mxu2 %v518_v3 }
 0x213   :  { %v364_v11 = vpop.f32.mrf.mxu2 }
 0x214   :  { %v365_v13 = vadd.f32 %v364_v11, %v334_v8 }
 0x216   :  { %v376_v15 = vmax.f32 %v365_v13, 0.0 }
 0x218   :  { %816 = vmatmul.msk.f32.vlgmr.msrb.gmra.mxu3 %vm174_vm0, %v376_v15  ;;  %v235_v15 = vadd.f32 %v1054_v4, %v1035_v21  ;;  %v571_v4 = vld [vmem:[#allocation2 + $0xd8] sm:$0xff] }
 0x219   :  { %597 = vmatpush.msra.mxu3 %v571_v4 }
 0x21b   :  { %v367_v17 = vpop.f32.mrf.mxu2  ;;  %598 = vmatpush.msra.mxu3 %v570_v28 }
 0x21c   :  { %v368_v18 = vadd.f32 %v367_v17, %v334_v8 }
 0x21d   :  { %599 = vmatpush.msra.mxu3 %v569_v31 }
 0x21e   :  { %v377_v19 = vmax.f32 %v368_v18, 0.0 }
 0x220   :  { %817 = vmatmul.msk.f32.gmra.mxu3 %vm174_vm0, %v377_v19  ;;  %v238_v19 = vadd.f32 %v1056_v5, %v1035_v21 }
 0x229   :  { %v370_v23 = vpop.f32.mrf.mxu2 }
 0x22a   :  { %v371_v20 = vadd.f32 %v370_v23, %v334_v8 }
 0x22c   :  { %v378_v29 = vmax.f32 %v371_v20, 0.0 }
 0x22e   :  { %818 = vmatmul.msk.f32.gmra.mxu3 %vm174_vm0, %v378_v29  ;;  %v517_v29 = vld [vmem:[#allocation2 + $0xa0] sm:$0xff] }
 0x22f   :  { %549 = vmatpush.msra.mxu2 %v517_v29 }
 0x231   :  { %v373_v22 = vpop.f32.mrf.mxu2 }
 0x232   :  { %v374_v30 = vadd.f32 %v373_v22, %v334_v8  ;;  %v470_v22 = vperm.slane %v996_v24, 6 }
 0x234   :  { %v379_v25 = vmax.f32 %v374_v30, 0.0 }
 0x236   :  { %819 = vmatmul.msk.f32.gmra.mxu3 %vm174_vm0, %v379_v25 }
 0x29b   :  { %v414_v33 = vpop.f32.mrf.mxu3 }
 0x29c   :  { %v426_v38 = vsel %vm174_vm0, %v414_v33, 0.0 }
 0x2a3   :  { %v417_v37 = vpop.f32.mrf.mxu3 }
 0x2a4   :  { %v427_v39 = vsel %vm174_vm0, %v417_v37, 0.0 }
 0x2a5   :  { %v428_v41 = vadd.f32 %v427_v39, %v426_v38  ;;  %v568_v39 = vld [vmem:[#allocation2 + $0xc0] sm:$0xff] }
 0x2a6   :  { %600 = vmatpush.msra.mxu3 %v568_v39 }
 0x2a7   :  { %v429_v42 = vrot.slane %v428_v41, 4 }
 0x2a9   :  { %v430_v44 = vadd.f32 %v429_v42, %v428_v41 }
 0x2ab   :  { %v431_v45 = vrot.slane %v430_v44, 2 }
 0x2ad   :  { %v432_v47 = vadd.f32 %v431_v45, %v430_v44  ;;  %v622_v44 = vld [vmem:[#allocation2 + $0xf8] sm:$0xff]  ;;  %v621_v45 = vld [vmem:[#allocation2 + $0xf0] sm:$0xff] }
 0x2ae   :  { %648 = vmatpush.msrb.mxu0 %v622_v44 }
 0x2af   :  { %v433_v48 = vrot.slane %v432_v47, 1 }
 0x2b0   :  { %649 = vmatpush.msrb.mxu0 %v621_v45 }
 0x2b1   :  { %v434_v50 = vadd.f32 %v433_v48, %v432_v47  ;;  %v420_v51 = vpop.f32.mrf.mxu3  ;;  %v619_v47 = vld [vmem:[#allocation2 + $0xe0] sm:$0xff] }
 0x2b2   :  { %v449_v59 = vsel %vm174_vm0, %v420_v51, 0.0  ;;  %650 = vmatpush.msrb.mxu0 %v620_v46 }
 0x2b3   :  { %v442_v52 = vmul.f32 %v441_v27, %v434_v50 }
 0x2b4   :  { %651 = vmatpush.msrb.mxu0 %v619_v47 }
 0x2b5   :  { %v443_v53 = vadd.f32 %v442_v52, %v996_v24 }
 0x2b7   :  { %v444_v55 = vperm.slane %v443_v53, 5 }
 0x2b9   :  { %v445_v57 = vadd.f32 %v444_v55, %v229_v54  ;;  %v423_v58 = vpop.f32.mrf.mxu3  ;;  %v446_v6 = vadd.f32 %v444_v55, %v232_v61  ;;  %v41_v55 = vld [vmem:[%s1141_s5 + $0x8] sm:$0x7]  ;;  %v672_v61 = vld [vmem:[#allocation2 + $0x110] sm:$0xff] }
 0x2ba   :  { %v450_v60 = vsel %vm174_vm0, %v423_v58, 0.0  ;;  %v572_v56 = vperm.slane %v41_v55, 0 }
 0x2bb   :  { %v447_v62 = vmax.f32 %v445_v57, 0.0  ;;  %v451_v63 = vadd.f32 %v450_v60, %v449_v59  ;;  %v448_v9 = vmax.f32 %v446_v6, 0.0  ;;  %v673_v60 = vld [vmem:[#allocation2 + $0x118] sm:$0xff] }
 0x2bc   :  { %699 = vmatpush.msra.mxu1 %v673_v60 }
 0x2bd   :  { %v452_v2 = vrot.slane %v451_v63, 4  ;;  %820 = vmatmul.msk.f32.vlgmr.msrb.gmra.mxu1 %vm174_vm0, %v447_v62  ;;  %v671_v62 = vld [vmem:[#allocation2 + $0x108] sm:$0xff] }
 0x2be   :  { %700 = vmatpush.msra.mxu1 %v672_v61 }
 0x2bf   :  { %v453_v7 = vadd.f32 %v452_v2, %v451_v63 }
 0x2c0   :  { %701 = vmatpush.msra.mxu1 %v671_v62 }
 0x2c1   :  { %v454_v8 = vrot.slane %v453_v7, 2 }
 0x2c3   :  { %v455_v10 = vadd.f32 %v454_v8, %v453_v7 }
 0x2c5   :  { %v456_v11 = vrot.slane %v455_v10, 1  ;;  %821 = vmatmul.msk.f32.gmra.mxu1 %vm174_vm0, %v448_v9 }
 0x2c7   :  { %v457_v12 = vadd.f32 %v456_v11, %v455_v10  ;;  %v670_v10 = vld [vmem:[#allocation2 + $0x100] sm:$0xff]  ;;  %v623_v11 = vperm.slane %v41_v55, 1 }
 0x2c8   :  { %702 = vmatpush.msra.mxu1 %v670_v10 }
 0x2c9   :  { %v458_v13 = vmul.f32 %v457_v12, %v441_v27 }
 0x2cb   :  { %v459_v14 = vadd.f32 %v458_v13, %v996_v24 }
 0x2cd   :  { %v460_v16 = vperm.slane %v459_v14, 5 }
 0x2cf   :  { %v461_v17 = vadd.f32 %v460_v16, %v235_v15  ;;  %v462_v23 = vadd.f32 %v460_v16, %v238_v19 }
 0x2d1   :  { %v463_v18 = vmax.f32 %v461_v17, 0.0  ;;  %v464_v20 = vmax.f32 %v462_v23, 0.0 }
 0x2d3   :  { %822 = vmatmul.msk.f32.gmra.mxu1 %vm174_vm0, %v463_v18 }
 0x2db   :  { %823 = vmatmul.msk.f32.gmra.mxu1 %vm174_vm0, %v464_v20 }
 0x33a   :  { %v500_v30 = vpop.f32.mrf.mxu1 }
 0x33b   :  { %v501_v25 = vadd.f32 %v500_v30, %v470_v22  ;;  %v674_v30 = vperm.slane %v41_v55, 2 }
 0x33d   :  { %v512_v26 = vmax.f32 %v501_v25, 0.0 }
 0x33f   :  { %824 = vmatmul.msk.f32.vlgmr.msra.gmra.mxu2 %vm174_vm0, %v512_v26 }
 0x342   :  { %v503_v21 = vpop.f32.mrf.mxu1 }
 0x343   :  { %v504_v5 = vadd.f32 %v503_v21, %v470_v22 }
 0x345   :  { %v513_v32 = vmax.f32 %v504_v5, 0.0 }
 0x347   :  { %825 = vmatmul.msk.f32.gmra.mxu2 %vm174_vm0, %v513_v32 }
 0x350   :  { %v506_v33 = vpop.f32.mrf.mxu1 }
 0x351   :  { %v507_v34 = vadd.f32 %v506_v33, %v470_v22 }
 0x353   :  { %v514_v35 = vmax.f32 %v507_v34, 0.0 }
 0x355   :  { %826 = vmatmul.msk.f32.gmra.mxu2 %vm174_vm0, %v514_v35 }
 0x358   :  { %v509_v36 = vpop.f32.mrf.mxu1 }
 0x359   :  { %v510_v37 = vadd.f32 %v509_v36, %v470_v22 }
 0x35b   :  { %v515_v38 = vmax.f32 %v510_v37, 0.0 }
 0x35d   :  { %827 = vmatmul.msk.f32.gmra.mxu2 %vm174_vm0, %v515_v38 }
 0x3c2   :  { %v551_v41 = vpop.f32.mrf.mxu2 }
 0x3c3   :  { %v552_v42 = vadd.f32 %v551_v41, %v521_v40 }
 0x3c5   :  { %v563_v43 = vmax.f32 %v552_v42, 0.0  ;;  %v716_v42 = vlaneseq }
 0x3c7   :  { %828 = vmatmul.msk.f32.vlgmr.msra.gmra.mxu3 %vm174_vm0, %v563_v43 }
 0x3ca   :  { %v554_v48 = vpop.f32.mrf.mxu2 }
 0x3cb   :  { %v555_v49 = vadd.f32 %v554_v48, %v521_v40 }
 0x3cd   :  { %v564_v27 = vmax.f32 %v555_v49, 0.0 }
 0x3cf   :  { %829 = vmatmul.msk.f32.gmra.mxu3 %vm174_vm0, %v564_v27 }
 0x3d8   :  { %v557_v50 = vpop.f32.mrf.mxu2 }
 0x3d9   :  { %v558_v24 = vadd.f32 %v557_v50, %v521_v40  ;;  %v1107_v50 = vand.u32 127, %v716_v42 }
 0x3db   :  { %v565_v51 = vmax.f32 %v558_v24, 0.0  ;;  %vm718_vm3 = vcmp.lt.s32.totalorder %v1107_v50, 1 }
 0x3dd   :  { %830 = vmatmul.msk.f32.gmra.mxu3 %vm174_vm0, %v565_v51 }
 0x3e0   :  { %v560_v52 = vpop.f32.mrf.mxu2 }
 0x3e1   :  { %v561_v53 = vadd.f32 %v560_v52, %v521_v40 }
 0x3e3   :  { %v566_v54 = vmax.f32 %v561_v53, 0.0 }
 0x3e5   :  { %831 = vmatmul.msk.f32.gmra.mxu3 %vm174_vm0, %v566_v54 }
 0x44a   :  { %v602_v57 = vpop.f32.mrf.mxu3 }
 0x44b   :  { %v603_v58 = vadd.f32 %v602_v57, %v572_v56 }
 0x44d   :  { %v614_v59 = vmax.f32 %v603_v58, 0.0 }
 0x44f   :  { %832 = vmatmul.msk.f32.vlgmr.msrb.gmra.mxu0 %vm174_vm0, %v614_v59 }
 0x452   :  { %v605_v63 = vpop.f32.mrf.mxu3 }
 0x453   :  { %v606_v0 = vadd.f32 %v605_v63, %v572_v56 }
 0x455   :  { %v615_v1 = vmax.f32 %v606_v0, 0.0 }
 0x457   :  { %833 = vmatmul.msk.f32.gmra.mxu0 %vm174_vm0, %v615_v1 }
 0x460   :  { %v608_v2 = vpop.f32.mrf.mxu3 }
 0x461   :  { %v609_v3 = vadd.f32 %v608_v2, %v572_v56 }
 0x463   :  { %v616_v6 = vmax.f32 %v609_v3, 0.0 }
 0x465   :  { %834 = vmatmul.msk.f32.gmra.mxu0 %vm174_vm0, %v616_v6 }
 0x468   :  { %v611_v7 = vpop.f32.mrf.mxu3 }
 0x469   :  { %v612_v8 = vadd.f32 %v611_v7, %v572_v56 }
 0x46b   :  { %v617_v9 = vmax.f32 %v612_v8, 0.0 }
 0x46d   :  { %835 = vmatmul.msk.f32.gmra.mxu0 %vm174_vm0, %v617_v9 }
 0x4cc   :  { %v653_v12 = vpop.f32.mrf.mxu0 }
 0x4cd   :  { %v654_v13 = vadd.f32 %v653_v12, %v623_v11 }
 0x4cf   :  { %v665_v14 = vmax.f32 %v654_v13, 0.0 }
 0x4d1   :  { %836 = vmatmul.msk.f32.vlgmr.msra.gmra.mxu1 %vm174_vm0, %v665_v14 }
 0x4d4   :  { %v656_v15 = vpop.f32.mrf.mxu0 }
 0x4d5   :  { %v657_v16 = vadd.f32 %v656_v15, %v623_v11 }
 0x4d7   :  { %v666_v17 = vmax.f32 %v657_v16, 0.0 }
 0x4d9   :  { %837 = vmatmul.msk.f32.gmra.mxu1 %vm174_vm0, %v666_v17 }
 0x4e2   :  { %v659_v18 = vpop.f32.mrf.mxu0 }
 0x4e3   :  { %v660_v19 = vadd.f32 %v659_v18, %v623_v11 }
 0x4e5   :  { %v667_v23 = vmax.f32 %v660_v19, 0.0 }
 0x4e7   :  { %838 = vmatmul.msk.f32.gmra.mxu1 %vm174_vm0, %v667_v23 }
 0x4ea   :  { %v662_v20 = vpop.f32.mrf.mxu0 }
 0x4eb   :  { %v663_v29 = vadd.f32 %v662_v20, %v623_v11 }
 0x4ed   :  { %v668_v22 = vmax.f32 %v663_v29, 0.0 }
 0x4ef   :  { %839 = vmatmul.msk.f32.gmra.mxu1 %vm174_vm0, %v668_v22 }
 0x54e   :  { %v704_v25 = vpop.f32.mrf.mxu1 }
 0x54f   :  { %v705_v26 = vadd.f32 %v704_v25, %v674_v30 }
 0x551   :  { %v723_v4 = vand.u32 2147483647, %v705_v26  ;;  %v719_v27 = vmax.f32 %v705_v26, 0.0 }
 0x553   :  { %v727_v28 = vsub.f32 0.0, %v723_v4 }
 0x555   :  { %v731_v31 = vmul.f32 1.442695, %v727_v28 }
 0x556   :  { %v707_v21 = vpop.f32.mrf.mxu1 }
 0x557   :  { %869 = vpow2.f32 %v731_v31  ;;  %v708_v5 = vadd.f32 %v707_v21, %v674_v30 }
 0x559   :  { %v724_v32 = vand.u32 2147483647, %v708_v5  ;;  %v720_v1 = vmax.f32 %v708_v5, 0.0 }
 0x55b   :  { %v728_v33 = vsub.f32 0.0, %v724_v32 }
 0x55d   :  { %v870_v34 = vpop.eup %869  ;;  %v733_v35 = vmul.f32 1.442695, %v728_v33 }
 0x55e   :  { %v739_v36 = vadd.f32 1.0, %v870_v34  ;;  %v742_v37 = vmul.f32 -0.5, %v870_v34  ;;  %v745_v39 = vand.u32 2147483647, %v870_v34 }
 0x55f   :  { %871 = vpow2.f32 %v733_v35 }
 0x560   :  { %873 = vlog2.f32 %v739_v36  ;;  %v743_v38 = vadd.f32 1.0, %v742_v37  ;;  %vm746_vm2 = vcmp.lt.f32.partialorder %v745_v39, 0.0004427343 }
 0x562   :  { %v744_v47 = vmul.f32 %v870_v34, %v743_v38 }
 0x564   :  { %v710_v40 = vpop.f32.mrf.mxu1 }
 0x565   :  { %v872_v41 = vpop.eup %871  ;;  %v1104_v43 = vadd.f32 %v710_v40, %v674_v30 }
 0x566   :  { %v874_v44 = vpop.eup %873  ;;  %v748_v45 = vadd.f32 1.0, %v872_v41  ;;  %v751_v48 = vmul.f32 -0.5, %v872_v41  ;;  %v754_v56 = vand.u32 2147483647, %v872_v41 }
 0x567   :  { %v741_v46 = vmul.f32 0.6931472, %v874_v44  ;;  %v725_v49 = vand.u32 2147483647, %v1104_v43  ;;  %v721_v29 = vmax.f32 %v1104_v43, 0.0 }
 0x568   :  { %875 = vlog2.f32 %v748_v45  ;;  %v752_v53 = vadd.f32 1.0, %v751_v48  ;;  %vm755_vm4 = vcmp.lt.f32.partialorder %v754_v56, 0.0004427343 }
 0x569   :  { %v747_v24 = vsel %vm746_vm2, %v744_v47, %v741_v46  ;;  %v729_v51 = vsub.f32 0.0, %v725_v49 }
 0x56a   :  { %v775_v52 = vadd.f32 %v747_v24, %v719_v27  ;;  %v753_v62 = vmul.f32 %v872_v41, %v752_v53 }
 0x56b   :  { %v735_v54 = vmul.f32 1.442695, %v729_v51 }
 0x56c   :  { %v779_v55 = vmul.f32 0.99, %v775_v52  ;;  %v713_v57 = vpop.f32.mrf.mxu1 }
 0x56d   :  { %877 = vpow2.f32 %v735_v54  ;;  %v714_v58 = vadd.f32 %v713_v57, %v674_v30 }
 0x56e   :  { %v876_v59 = vpop.eup %875  ;;  %v783_v60 = vadd.f32 0.01, %v779_v55 }
 0x56f   :  { %v750_v61 = vmul.f32 0.6931472, %v876_v59  ;;  %v726_v63 = vand.u32 2147483647, %v714_v58  ;;  %v722_v33 = vmax.f32 %v714_v58, 0.0 }
 0x570   :  { %v787_v0 = vsel %vm718_vm3, %v705_v26, %v783_v60 }
 0x571   :  { %791 = vst.msk [vmem:[%s1142_s6] sm:$0xff] %vm174_vm0, %v787_v0  ;;  %v756_v2 = vsel %vm755_vm4, %v753_v62, %v750_v61  ;;  %v730_v3 = vsub.f32 0.0, %v726_v63 }
 0x572   :  { %v776_v6 = vadd.f32 %v756_v2, %v720_v1 }
 0x573   :  { %v878_v7 = vpop.eup %877  ;;  %v737_v8 = vmul.f32 1.442695, %v730_v3 }
 0x574   :  { %v780_v9 = vmul.f32 0.99, %v776_v6  ;;  %v757_v10 = vadd.f32 1.0, %v878_v7  ;;  %v760_v11 = vmul.f32 -0.5, %v878_v7  ;;  %v763_v15 = vand.u32 2147483647, %v878_v7 }
 0x575   :  { %879 = vpow2.f32 %v737_v8 }
 0x576   :  { %v784_v12 = vadd.f32 0.01, %v780_v9  ;;  %881 = vlog2.f32 %v757_v10  ;;  %v761_v14 = vadd.f32 1.0, %v760_v11  ;;  %vm764_vm5 = vcmp.lt.f32.partialorder %v763_v15, 0.0004427343 }
 0x578   :  { %v788_v13 = vsel %vm718_vm3, %v708_v5, %v784_v12  ;;  %v762_v23 = vmul.f32 %v878_v7, %v761_v14 }
 0x579   :  { %792 = vst.msk [vmem:[%s1142_s6 + $0x8] sm:$0xff] %vm174_vm0, %v788_v13 }
 0x57b   :  { %v880_v16 = vpop.eup %879 }
 0x57c   :  { %v882_v17 = vpop.eup %881  ;;  %v766_v18 = vadd.f32 1.0, %v880_v16  ;;  %v769_v20 = vmul.f32 -0.5, %v880_v16  ;;  %v772_v4 = vand.u32 2147483647, %v880_v16 }
 0x57d   :  { %v759_v19 = vmul.f32 0.6931472, %v882_v17 }
 0x57e   :  { %883 = vlog2.f32 %v766_v18  ;;  %v770_v25 = vadd.f32 1.0, %v769_v20  ;;  %vm773_vm6 = vcmp.lt.f32.partialorder %v772_v4, 0.0004427343 }
 0x57f   :  { %v765_v22 = vsel %vm764_vm5, %v762_v23, %v759_v19 }
 0x580   :  { %v777_v30 = vadd.f32 %v765_v22, %v721_v29  ;;  %v771_v5 = vmul.f32 %v880_v16, %v770_v25 }
 0x582   :  { %v781_v26 = vmul.f32 0.99, %v777_v30 }
 0x584   :  { %v884_v28 = vpop.eup %883  ;;  %v785_v31 = vadd.f32 0.01, %v781_v26 }
 0x585   :  { %v768_v21 = vmul.f32 0.6931472, %v884_v28 }
 0x586   :  { %v789_v32 = vsel %vm718_vm3, %v1104_v43, %v785_v31 }
 0x587   :  { %793 = vst.msk [vmem:[%s1142_s6 + $0x10] sm:$0xff] %vm174_vm0, %v789_v32  ;;  %v774_v34 = vsel %vm773_vm6, %v771_v5, %v768_v21 }
 0x588   :  { %v778_v35 = vadd.f32 %v774_v34, %v722_v33 }
 0x58a   :  { %v782_v36 = vmul.f32 0.99, %v778_v35 }
 0x58c   :  { %v786_v37 = vadd.f32 0.01, %v782_v36 }
 0x58e   :  { %v790_v38 = vsel %vm718_vm3, %v714_v58, %v786_v37 }
 0x58f   :  { %794 = vst.msk [vmem:[%s1142_s6 + $0x18] sm:$0xff] %vm174_vm0, %v790_v38 }
 0x590   :  { %799 = vsyncpa [#allocation3], 1 }

</bundles_post_ra>
